<compile_context>
chip_gen: v7x
topology: tpu7x:2x2x1
jax: 0.10.0
libtpu: 0.0.40
codegen_flags: <defaults>
</compile_context>

<pallas_src>
import jax
import jax.numpy as jnp
from jax.experimental import pallas as pl
from jax.experimental.pallas import tpu as pltpu

IN_FEATURES = 2
HIDDEN = 10
OUT_FEATURES = 2

_MIN_TILE_B = 128    # once B >= 2*128, keep >= 2 grid tiles (v7x: both TCs)
_MAX_TILE_B = 4096   # ~2 MiB lane-padded DMA per step >> 0.35 us step overhead


def _round_up(n, m):
    return ((n + m - 1) // m) * m


def _choose_tile_b(batch):
    """Batch tile: full-extent block for small B, otherwise a multiple of 8 that
    yields >= 2 grid steps (so the 'parallel' axis splits across v7x's 2 TCs)."""
    if batch <= _MIN_TILE_B:
        return batch                                  # single full-extent block
    half = _round_up(pl.cdiv(batch, 2), 8)
    tile = min(_MAX_TILE_B, max(_MIN_TILE_B, half))
    return min(tile, batch)


def _net_kernel(x_ref, w1t_ref, b1_ref, w2_ref, b2_ref, o_ref):
    """One batch tile in the natural PyTorch layout.

    x_ref  : [TB, 2]    input tile (batch on sublanes)
    w1t_ref: [2, 10]    layer-1 weight, pre-transposed to [in, out]
    b1_ref : [1, 10]
    w2_ref : [2, 10]    layer-2 weight in PyTorch [out, in] layout
    b2_ref : [2]        SMEM scalars
    o_ref  : [TB, 2]    output tile
    """
    x0 = x_ref[:, 0:1]                                    # [TB, 1]
    x1 = x_ref[:, 1:2]                                    # [TB, 1]

    # ---- Layer 1: K == 2, unrolled on the VPU with whole-row weight operands.
    pre = x0 * w1t_ref[0:1, :] + x1 * w1t_ref[1:2, :] + b1_ref[...]   # [TB, 10]

    # ---- Exact sigmoid: exp on the EUP + exact reciprocal (kernel is DMA-bound,
    # so the extra Newton steps are hidden).
    h = 1.0 / (1.0 + jnp.exp(-pre))                       # [TB, 10]

    # ---- Layer 2: per output, broadcast multiply + minor-axis (XLU) reduction.
    y0 = jnp.sum(h * w2_ref[0:1, :], axis=1, keepdims=True) + b2_ref[0]
    y1 = jnp.sum(h * w2_ref[1:2, :], axis=1, keepdims=True) + b2_ref[1]

    o_ref[:, 0:1] = y0.astype(o_ref.dtype)
    o_ref[:, 1:2] = y1.astype(o_ref.dtype)


@jax.jit
def net_forward(x, w1, b1, w2, b2):
    """x: [B, 2] f32.  Weights in PyTorch layout: w1 [10,2], b1 [10], w2 [2,10], b2 [2].

    Returns [B, 2] f32 — same semantics as Net.forward.  No layout ops touch x or
    the output; only the 34 parameter scalars get reshaped (negligible).
    """
    batch = x.shape[0]
    n_in = w1.shape[1]
    n_hidden = w1.shape[0]
    n_out = w2.shape[0]

    tile_b = _choose_tile_b(batch)
    grid = (pl.cdiv(batch, tile_b),)

    w1t = w1.T                           # [2, 10]  parameter-only transform
    b1r = b1.reshape(1, n_hidden)        # [1, 10]

    return pl.pallas_call(
        _net_kernel,
        out_shape=jax.ShapeDtypeStruct((batch, n_out), jnp.float32),
        grid=grid,
        in_specs=[
            pl.BlockSpec((tile_b, n_in), lambda i: (i, 0)),        # x tile (pipelined)
            pl.BlockSpec((n_in, n_hidden), lambda i: (0, 0)),      # w1t: VMEM-resident
            pl.BlockSpec((1, n_hidden), lambda i: (0, 0)),         # b1 : VMEM-resident
            pl.BlockSpec((n_out, n_hidden), lambda i: (0, 0)),     # w2 : VMEM-resident
            pl.BlockSpec(memory_space=pltpu.MemorySpace.SMEM),     # b2 : SMEM scalars
        ],
        out_specs=pl.BlockSpec((tile_b, n_out), lambda i: (i, 0)),
        compiler_params=pltpu.CompilerParams(
            dimension_semantics=("parallel",),   # independent batch tiles (v7x: 2 TCs)
            vmem_limit_bytes=32 * 1024 * 1024,
        ),
    )(x, w1t, b1r, w2, b2)


def init_params(key):
    """Deterministic init matching nn.Linear (PyTorch [out, in] layout)."""
    k1, k2, k3, k4 = jax.random.split(key, 4)
    lim1 = 1.0 / jnp.sqrt(float(IN_FEATURES))
    lim2 = 1.0 / jnp.sqrt(float(HIDDEN))
    w1 = jax.random.uniform(k1, (HIDDEN, IN_FEATURES), jnp.float32, -lim1, lim1)
    b1 = jax.random.uniform(k2, (HIDDEN,), jnp.float32, -lim1, lim1)
    w2 = jax.random.uniform(k3, (OUT_FEATURES, HIDDEN), jnp.float32, -lim2, lim2)
    b2 = jax.random.uniform(k4, (OUT_FEATURES,), jnp.float32, -lim2, lim2)
    return w1, b1, w2, b2


def reference_forward(x, w1, b1, w2, b2):
    h = jax.nn.sigmoid(x @ w1.T + b1)
    return h @ w2.T + b2


if __name__ == "__main__":
    key = jax.random.PRNGKey(0)
    kx, kp, kx2, kx3 = jax.random.split(key, 4)
    w1, b1, w2, b2 = init_params(kp)

    # Exact sigmoid in-kernel -> tight tolerance (was 5e-3 with approx recip).
    TOL = 1e-4

    # Small XOR-style batch (single full-extent block).
    B = 8
    x = jax.random.uniform(kx, (B, IN_FEATURES), jnp.float32)
    out = jax.block_until_ready(net_forward(x, w1, b1, w2, b2))
    ref = reference_forward(x, w1, b1, w2, b2)
    assert out.shape == (B, OUT_FEATURES)
    assert jnp.allclose(out, ref, atol=TOL, rtol=TOL)

    # Larger batch -> 2-tile grid (both TensorCores on v7x), divides evenly.
    B2 = 1536
    x2 = jax.random.uniform(kx2, (B2, IN_FEATURES), jnp.float32)
    out2 = jax.block_until_ready(net_forward(x2, w1, b1, w2, b2))
    ref2 = reference_forward(x2, w1, b1, w2, b2)
    assert out2.shape == (B2, OUT_FEATURES)
    assert jnp.allclose(out2, ref2, atol=TOL, rtol=TOL)

    # Ragged batch -> exercises the masked partial last block (no host pad).
    B3 = 1000
    x3 = jax.random.uniform(kx3, (B3, IN_FEATURES), jnp.float32)
    out3 = jax.block_until_ready(net_forward(x3, w1, b1, w2, b2))
    ref3 = reference_forward(x3, w1, b1, w2, b2)
    assert out3.shape == (B3, OUT_FEATURES)
    assert jnp.allclose(out3, ref3, atol=TOL, rtol=TOL)

    print("KERNEL_OK")
</pallas_src>

<mosaic_0001>
module attributes {stable_mosaic.version = 11 : i64} {
  func.func @_net_kernel(%arg0: i32, %arg1: memref<8x2xf32, #tpu.memory_space<vmem>>, %arg2: memref<2x10xf32, #tpu.memory_space<vmem>>, %arg3: memref<1x10xf32, #tpu.memory_space<vmem>>, %arg4: memref<2x10xf32, #tpu.memory_space<vmem>>, %arg5: memref<2xf32, #tpu.memory_space<smem>>, %arg6: memref<8x2xf32, #tpu.memory_space<vmem>>) attributes {dimension_semantics = [#tpu.dimension_semantics<parallel>], iteration_bounds = array<i64: 1>, scalar_prefetch = 0 : i64, scratch_operands = 0 : i64, tpu.core_type = #tpu.core_type<tc>, window_params = [{transform_indices = @transform_0, window_bounds = array<i64: 8, 2>}, {pipeline_mode = #tpu.pipeline_mode<synchronous>, transform_indices = @transform_1, window_bounds = array<i64: 2, 10>}, {pipeline_mode = #tpu.pipeline_mode<synchronous>, transform_indices = @transform_2, window_bounds = array<i64: 1, 10>}, {pipeline_mode = #tpu.pipeline_mode<synchronous>, transform_indices = @transform_3, window_bounds = array<i64: 2, 10>}, {transform_indices = @transform_4, window_bounds = array<i64: 2>}, {transform_indices = @transform_5, window_bounds = array<i64: 8, 2>}]} {
    %c0 = arith.constant 0 : index
    %c0_0 = arith.constant 0 : index
    %0 = vector.load %arg1[%c0, %c0_0] : memref<8x2xf32, #tpu.memory_space<vmem>>, vector<8x1xf32>
    %c0_1 = arith.constant 0 : index
    %c1 = arith.constant 1 : index
    %1 = vector.load %arg1[%c0_1, %c1] : memref<8x2xf32, #tpu.memory_space<vmem>>, vector<8x1xf32>
    %c0_2 = arith.constant 0 : index
    %c0_3 = arith.constant 0 : index
    %2 = vector.load %arg2[%c0_2, %c0_3] : memref<2x10xf32, #tpu.memory_space<vmem>>, vector<1x10xf32>
    %3 = vector.broadcast %0 : vector<8x1xf32> to vector<8x10xf32>
    %4 = vector.broadcast %2 : vector<1x10xf32> to vector<8x10xf32>
    %5 = arith.mulf %3, %4 : vector<8x10xf32>
    %c1_4 = arith.constant 1 : index
    %c0_5 = arith.constant 0 : index
    %6 = vector.load %arg2[%c1_4, %c0_5] : memref<2x10xf32, #tpu.memory_space<vmem>>, vector<1x10xf32>
    %7 = vector.broadcast %1 : vector<8x1xf32> to vector<8x10xf32>
    %8 = vector.broadcast %6 : vector<1x10xf32> to vector<8x10xf32>
    %9 = arith.mulf %7, %8 : vector<8x10xf32>
    %10 = arith.addf %5, %9 : vector<8x10xf32>
    %c0_6 = arith.constant 0 : index
    %c0_7 = arith.constant 0 : index
    %11 = vector.load %arg3[%c0_6, %c0_7] : memref<1x10xf32, #tpu.memory_space<vmem>>, vector<1x10xf32>
    %12 = vector.broadcast %11 : vector<1x10xf32> to vector<8x10xf32>
    %13 = arith.addf %10, %12 : vector<8x10xf32>
    %cst = arith.constant 0.000000e+00 : f32
    %14 = vector.broadcast %cst : f32 to vector<8x10xf32>
    %15 = arith.subf %14, %13 : vector<8x10xf32>
    %16 = math.exp %15 : vector<8x10xf32>
    %cst_8 = arith.constant 1.000000e+00 : f32
    %17 = vector.broadcast %cst_8 : f32 to vector<8x10xf32>
    %18 = arith.addf %17, %16 : vector<8x10xf32>
    %cst_9 = arith.constant 1.000000e+00 : f32
    %19 = vector.broadcast %cst_9 : f32 to vector<8x10xf32>
    %20 = arith.divf %19, %18 : vector<8x10xf32>
    %c0_10 = arith.constant 0 : index
    %c0_11 = arith.constant 0 : index
    %21 = vector.load %arg4[%c0_10, %c0_11] : memref<2x10xf32, #tpu.memory_space<vmem>>, vector<1x10xf32>
    %22 = vector.broadcast %21 : vector<1x10xf32> to vector<8x10xf32>
    %23 = arith.mulf %20, %22 : vector<8x10xf32>
    %cst_12 = arith.constant dense<0.000000e+00> : vector<8xf32>
    %24 = vector.multi_reduction <add>, %23, %cst_12 [1] : vector<8x10xf32> to vector<8xf32>
    %25 = vector.shape_cast %24 : vector<8xf32> to vector<8x1xf32>
    %c0_13 = arith.constant 0 : index
    %26 = memref.load %arg5[%c0_13] : memref<2xf32, #tpu.memory_space<smem>>
    %27 = vector.broadcast %26 : f32 to vector<8x1xf32>
    %28 = arith.addf %25, %27 : vector<8x1xf32>
    %c1_14 = arith.constant 1 : index
    %c0_15 = arith.constant 0 : index
    %29 = vector.load %arg4[%c1_14, %c0_15] : memref<2x10xf32, #tpu.memory_space<vmem>>, vector<1x10xf32>
    %30 = vector.broadcast %29 : vector<1x10xf32> to vector<8x10xf32>
    %31 = arith.mulf %20, %30 : vector<8x10xf32>
    %cst_16 = arith.constant dense<0.000000e+00> : vector<8xf32>
    %32 = vector.multi_reduction <add>, %31, %cst_16 [1] : vector<8x10xf32> to vector<8xf32>
    %33 = vector.shape_cast %32 : vector<8xf32> to vector<8x1xf32>
    %c1_17 = arith.constant 1 : index
    %34 = memref.load %arg5[%c1_17] : memref<2xf32, #tpu.memory_space<smem>>
    %35 = vector.broadcast %34 : f32 to vector<8x1xf32>
    %36 = arith.addf %33, %35 : vector<8x1xf32>
    %c0_18 = arith.constant 0 : index
    %c0_19 = arith.constant 0 : index
    %37 = vector.load %arg6[%c0_18, %c0_19] : memref<8x2xf32, #tpu.memory_space<vmem>>, vector<8x1xf32>
    tpu.vector_store %arg6[%c0_18, %c0_19], %28 {strides = array<i32>} : memref<8x2xf32, #tpu.memory_space<vmem>>, vector<8x1xf32>,
    %c0_20 = arith.constant 0 : index
    %c1_21 = arith.constant 1 : index
    %38 = vector.load %arg6[%c0_20, %c1_21] : memref<8x2xf32, #tpu.memory_space<vmem>>, vector<8x1xf32>
    tpu.vector_store %arg6[%c0_20, %c1_21], %36 {strides = array<i32>} : memref<8x2xf32, #tpu.memory_space<vmem>>, vector<8x1xf32>,
    return
  }
  func.func @transform_0(%arg0: i32) -> (i32, i32) {
    %c0_i32 = arith.constant 0 : i32
    %c0_i32_0 = arith.constant 0 : i32
    return %arg0, %c0_i32 : i32, i32
  }
  func.func @transform_1(%arg0: i32) -> (i32, i32) {
    %c0_i32 = arith.constant 0 : i32
    %c0_i32_0 = arith.constant 0 : i32
    %c0_i32_1 = arith.constant 0 : i32
    return %c0_i32, %c0_i32_0 : i32, i32
  }
  func.func @transform_2(%arg0: i32) -> (i32, i32) {
    %c0_i32 = arith.constant 0 : i32
    %c0_i32_0 = arith.constant 0 : i32
    %c0_i32_1 = arith.constant 0 : i32
    return %c0_i32, %c0_i32_0 : i32, i32
  }
  func.func @transform_3(%arg0: i32) -> (i32, i32) {
    %c0_i32 = arith.constant 0 : i32
    %c0_i32_0 = arith.constant 0 : i32
    %c0_i32_1 = arith.constant 0 : i32
    return %c0_i32, %c0_i32_0 : i32, i32
  }
  func.func @transform_4(%arg0: i32) -> i32 {
    %c0_i32 = arith.constant 0 : i32
    %c0_i32_0 = arith.constant 0 : i32
    return %c0_i32 : i32
  }
  func.func @transform_5(%arg0: i32) -> (i32, i32) {
    %c0_i32 = arith.constant 0 : i32
    %c0_i32_0 = arith.constant 0 : i32
    return %arg0, %c0_i32 : i32, i32
  }
}

</mosaic_0001>

<bundles_post_ra>
// kernel: net_forward.1
= control target key start
LH: loop header
LB: loop body
LE: loop exit
PB: predicated region body
PF: predicated region fallthrough
CT: control target
= control target key end

     0   :  { %10 = vsyncpa [#allocation3], 0  ;;  %s193_s0 = inlined_call_operand.vmem [shape: f32[8,2], index: 0, kind: input, shape index: {}]   ;;  %s194_s1 = inlined_call_operand.vmem [shape: f32[2,10], index: 1, kind: input, shape index: {}]   ;;  %s195_s2 = inlined_call_operand.vmem [shape: f32[1,10], index: 2, kind: input, shape index: {}]   ;;  %s196_s3 = inlined_call_operand.vmem [shape: f32[2,10], index: 3, kind: input, shape index: {}]   ;;  %s197_s4 = inlined_call_operand.vmem [shape: f32[2], index: 4, kind: input, shape index: {}]   ;;  %s198_s5 = inlined_call_operand.vmem [shape: f32[8,2], index: 5, kind: output, shape index: {}]  }
   0x1   :  { %s25_s20 = sshll.u32 %s197_s4, 4  ;;  %s26_s20 = int_to_ptr.vmem [resolvable:$true] %s25_s20 }
   0x2   :  { %s119_s21 = scalar_lea.vmem %s26_s20, 16  ;;  %p124_p1 = scmp.lt.s32.totalorder %s26_s20, %s26_s20 }
   0x3   :  { %p120_p0 = scmp.ne.s32.totalorder %s26_s20, %s119_s21  ;;  %p125_p2 = scmp.lt.s32.totalorder %s119_s21, %s119_s21 }
   0x5   :  { %p126_p3 = por %p125_p2, %p124_p1 }
   0x7   :  { %p127_p4 = pnand %p126_p3, %p120_p0 }
   0x9   :  { %130 = shalt.err (!%p127_p4)
}
   0xa   :  { %s133_s22 = smov [#allocation2]  }
   0xb   :  { %28 = dma.vmem_to_smem %s26_s20, 16, %s133_s22, [#allocation3]  }
   0xc   :  { %131 = dma.done.wait [#allocation3], 16  }
   0xd   :  { %132 = vsyncadd [#allocation3], 4294967280 }
   0xe   :  { %32 = sfence }
   0xf   :  { %v33_v0 = vld [vmem:[%s193_s0] sm:$0xff]  ;;  %v134_v1 = vmov 0   ;;  %v135_v2 = vmov 1   ;;  %vm76_vm0 = vcmask 80896   ;;  %s109_s7 = sld [smem:[#allocation2 + $0x1]]  ;;  %vm95_vm1 = vcmask 7168  }
  0x10   :  { %113 = vset.pattern.permute.xlu0 %v134_v1  ;;  %v104_v4 = vld [vmem:[%s194_s1] ss:$0 sm:$0xff]  ;;  %v105_v5 = vld [vmem:[%s194_s1 + $0x1] ss:$0 sm:$0xff]  ;;  %vm97_vm2 = vcmask 15368  }
  0x11   :  { %37 = vperm.xlu0 %113, %v33_v0   ;;  %v106_v9 = vld [vmem:[%s195_s2] ss:$0 sm:$0xff]  ;;  %v108_v18 = vld [vmem:[%s196_s3 + $0x1] ss:$0 sm:$0xff]  ;;  %s80_s2 = sld [smem:[#allocation2]] }
  0x12   :  { %v107_v16 = vld [vmem:[%s196_s3] ss:$0 sm:$0xff] }
  0x15   :  { %114 = vset.pattern.permute.xlu0 %v135_v2  ;;  %v93_v26 = vstv %s109_s7 }
  0x16   :  { %47 = vperm.xlu0 %114, %v33_v0  }
  0x17   :  { %v81_v23 = vstv %s80_s2 }
  0x90   :  { %v38_v3 = vpop.permute.xlu0 %37 }
  0x91   :  { %v44_v7 = vmul.f32 %v104_v4, %v38_v3 }
  0x95   :  { %v48_v6 = vpop.permute.xlu0 %47 }
  0x96   :  { %v54_v8 = vmul.f32 %v105_v5, %v48_v6 }
  0x98   :  { %v55_v10 = vadd.f32 %v54_v8, %v44_v7 }
  0x9a   :  { %v63_v11 = vadd.f32 %v106_v9, %v55_v10 }
  0x9c   :  { %v64_v12 = vsub.f32 0.0, %v63_v11 }
  0x9e   :  { %v65_v13 = vmul.f32 1.442695, %v64_v12 }
  0xa0   :  { %115 = vpow2.f32 %v65_v13 }
  0xaa   :  { %v116_v14 = vpop.eup %115 }
  0xab   :  { %v67_v15 = vadd.f32 1.0, %v116_v14 }
  0xad   :  { %117 = vrcp.f32 %v67_v15 }
  0xb7   :  { %v118_v17 = vpop.eup %117 }
  0xb8   :  { %v75_v19 = vmul.f32 %v118_v17, %v107_v16  ;;  %v88_v21 = vmul.f32 %v118_v17, %v108_v18 }
  0xba   :  { %v77_v20 = vsel %vm76_vm0, %v75_v19, 0.0  ;;  %v89_v22 = vsel %vm76_vm0, %v88_v21, 0.0 }
  0xbb   :  { %78 = vadd.xlane.f32.xlu1 %v77_v20 }
  0xbf   :  { %90 = vadd.xlane.f32.xlu1 %v89_v22 }
 0x148   :  { %v79_v24 = vpop.xlane.xlu1 %78 }
 0x149   :  { %v82_v25 = vadd.f32 %v81_v23, %v79_v24 }
 0x14b   :  { %96 = vst.msk [vmem:[%s198_s5] sm:$0xff] %vm95_vm1, %v82_v25 }
 0x14c   :  { %v91_v27 = vpop.xlane.xlu1 %90 }
 0x14d   :  { %v94_v28 = vadd.f32 %v93_v26, %v91_v27 }
 0x14f   :  { %98 = vst.msk [vmem:[%s198_s5] sm:$0xff] %vm97_vm2, %v94_v28 }
 0x150   :  { %103 = vsyncpa [#allocation3], 1 }

</bundles_post_ra>
